<compile_context>
chip_gen: v6e
topology: v6e:2x2x1
jax: 0.10.0
libtpu: 0.0.40
codegen_flags: <defaults>
</compile_context>

<pallas_src>
import functools
import math

import jax
import jax.numpy as jnp
import numpy as np
from jax.experimental import pallas as pl
from jax.experimental.pallas import tpu as pltpu

NEG_INF = -1e30  # finite "minus infinity": avoids NaN from exp(-inf - -inf)


def _pick_tile(dim, candidates):
    for c in candidates:
        if dim % c == 0:
            return c
    return dim


# ------------------------------------------------------------------
# Tiled linear kernel: y = x @ w.T  (w in torch nn.Linear (N, K) layout)
# ------------------------------------------------------------------

def _matmul_kernel(x_ref, w_ref, o_ref, acc_ref):
    @pl.when(pl.program_id(2) == 0)
    def _init():
        acc_ref[...] = jnp.zeros_like(acc_ref)

    # x block: (tm, tk); w block: (tn, tk). Contract last dims -> (tm, tn).
    # MXU consumes the "transposed" operand natively; bf16 inputs, f32 accumulation.
    acc_ref[...] += jax.lax.dot_general(
        x_ref[...], w_ref[...],
        dimension_numbers=(((1,), (1,)), ((), ())),
        preferred_element_type=jnp.float32)

    @pl.when(pl.program_id(2) == pl.num_programs(2) - 1)
    def _store():
        o_ref[...] = acc_ref[...].astype(o_ref.dtype)


def linear_nobias(x2d, w, out_dtype=None):
    """x2d: (M, K); w: (N, K) torch Linear weight (no bias) -> (M, N) = x2d @ w.T."""
    M, K = x2d.shape
    N, K2 = w.shape
    assert K == K2
    out_dtype = x2d.dtype if out_dtype is None else out_dtype
    tm = _pick_tile(M, (512, 256, 128))
    tn = _pick_tile(N, (512, 256, 128))   # 256/512-wide N tiles fill v6e/v7x MXU
    tk = _pick_tile(K, (512, 256, 128))
    grid = (M // tm, N // tn, K // tk)
    return pl.pallas_call(
        _matmul_kernel,
        out_shape=jax.ShapeDtypeStruct((M, N), out_dtype),
        grid=grid,
        in_specs=[
            pl.BlockSpec((tm, tk), lambda i, j, k: (i, k)),
            pl.BlockSpec((tn, tk), lambda i, j, k: (j, k)),
        ],
        out_specs=pl.BlockSpec((tm, tn), lambda i, j, k: (i, j)),
        scratch_shapes=[pltpu.VMEM((tm, tn), jnp.float32)],
        compiler_params=pltpu.CompilerParams(
            dimension_semantics=("parallel", "parallel", "arbitrary")),
    )(x2d, w)


# ------------------------------------------------------------------
# Flash attention kernel: resident K/V + resident bias table, in-kernel KV loop
# ------------------------------------------------------------------

def _flash_attn_kernel(q_ref, k_ref, v_ref, bias_ref, o_ref, *,
                       block, num_kv_blocks, causal, sm_scale):
    # q_ref:    (hp, tq, D)              query tile (tq == block)
    # k_ref:    (hp, Skv, D)             whole K for this (batch, head-group), resident
    # v_ref:    (hp, Skv, D)             whole V, resident
    # bias_ref: (n_diag, hp, tq, block)  Toeplitz diagonal-block bias table, resident
    # o_ref:    (hp, tq, D)
    qi = pl.program_id(2)
    nq = pl.num_programs(2)

    q = q_ref[...]                       # bf16, fed to the MXU in native dtype
    hp, tq, head_dim = q.shape

    m0 = jnp.full((hp, tq, 1), NEG_INF, jnp.float32)
    l0 = jnp.zeros((hp, tq, 1), jnp.float32)
    acc0 = jnp.zeros((hp, tq, head_dim), jnp.float32)

    def kv_step(j, carry):
        m_prev, l_prev, acc_prev = carry
        start = pl.multiple_of(j * block, block)
        k = k_ref[:, pl.ds(start, block), :]                    # (hp, block, D)
        v = v_ref[:, pl.ds(start, block), :]                    # (hp, block, D)
        # Dynamic first-axis pick of the (k - q) diagonal: no per-step bias DMA.
        bias = bias_ref[j - qi + nq - 1].astype(jnp.float32)    # (hp, tq, block)

        # s[h, q, k] = sum_d q[h, q, d] * k[h, k, d]  (per-head MXU matmuls, f32 acc)
        s = jax.lax.dot_general(
            q, k, dimension_numbers=(((2,), (2,)), ((0,), (0,))),
            preferred_element_type=jnp.float32)
        if sm_scale != 1.0:
            s = s * sm_scale
        s = s + bias

        if causal:
            row = jax.lax.broadcasted_iota(jnp.int32, s.shape, 1) + qi * block
            col = jax.lax.broadcasted_iota(jnp.int32, s.shape, 2) + j * block
            s = jnp.where(col <= row, s, NEG_INF)

        m_new = jnp.maximum(m_prev, jnp.max(s, axis=-1, keepdims=True))
        alpha = jnp.exp(m_prev - m_new)
        p = jnp.exp(s - m_new)
        l_new = alpha * l_prev + jnp.sum(p, axis=-1, keepdims=True)
        pv = jax.lax.dot_general(
            p.astype(v.dtype), v,
            dimension_numbers=(((2,), (1,)), ((0,), (0,))),
            preferred_element_type=jnp.float32)
        acc_new = alpha * acc_prev + pv
        return m_new, l_new, acc_new

    # Causal: query block qi only needs KV blocks 0..qi (tq == block, Sq == Skv), so
    # masked blocks are never visited (and K/V are resident, so no dead DMA either).
    upper = (qi + 1) if causal else num_kv_blocks
    m, l, acc = jax.lax.fori_loop(0, upper, kv_step, (m0, l0, acc0))

    # Guard against l == 0 (only reachable once padding masks are supported).
    l = jnp.maximum(l, 1e-30)
    inv = pl.reciprocal(l, approx=True)      # EUP slot, essentially free
    inv = inv * (2.0 - l * inv)              # one Newton step -> ~f32 accuracy
    # TODO(synk): lane-dense (tq, hp*D) head-packed output layout so this store is an
    # unmasked 128-lane vst and the wrapper-side transposes disappear.
    o_ref[...] = (acc * inv).astype(o_ref.dtype)


def flash_attention(q, k, v, block_bias, *, block, heads_per_step, causal,
                    sm_scale=1.0):
    """q, k, v: (B, H, S, D); block_bias: (n_diag, H, block, block) -> (B, H, S, D)."""
    B, H, Sq, D = q.shape
    Skv = k.shape[2]
    assert Sq == Skv  # TODO(synk): cross-attention / KV-cache (Sq != Skv) path
    hp = heads_per_step
    assert Sq % block == 0 and H % hp == 0
    nq = Sq // block
    nkv = Skv // block
    n_diag = nq + nkv - 1
    assert block_bias.shape == (n_diag, H, block, block)

    kernel = functools.partial(_flash_attn_kernel, block=block,
                               num_kv_blocks=nkv, causal=causal, sm_scale=sm_scale)

    # Resident-footprint estimate -> explicit VMEM budget (v7x: 64 MiB physical).
    bpe = jnp.dtype(q.dtype).itemsize
    bias_bpe = jnp.dtype(block_bias.dtype).itemsize
    resident = 2 * (2 * hp * block * D * bpe              # q + out, double-buffered
                    + 2 * hp * Skv * D * bpe              # resident K + V
                    + n_diag * hp * block * block * bias_bpe)
    vmem_limit = int(min(64 * 2 ** 20, max(32 * 2 ** 20, resident + (8 << 20))))

    return pl.pallas_call(
        kernel,
        out_shape=jax.ShapeDtypeStruct((B, H, Sq, D), q.dtype),
        grid=(B, H // hp, nq),
        in_specs=[
            pl.BlockSpec((None, hp, block, D), lambda b, h, i: (b, h, i, 0)),
            # K/V: whole sequence resident per (b, head-group); block index constant
            # along the query axis, so the pipeline fetches them from HBM once.
            pl.BlockSpec((None, hp, Skv, D), lambda b, h, i: (b, h, 0, 0)),
            pl.BlockSpec((None, hp, Skv, D), lambda b, h, i: (b, h, 0, 0)),
            # Bias: head-group-resident diagonal-block table (Toeplitz dedup).
            pl.BlockSpec((n_diag, hp, block, block), lambda b, h, i: (0, h, 0, 0)),
        ],
        out_specs=pl.BlockSpec((None, hp, block, D), lambda b, h, i: (b, h, i, 0)),
        compiler_params=pltpu.CompilerParams(
            dimension_semantics=("parallel", "parallel", "parallel"),
            vmem_limit_bytes=vmem_limit),
    )(q, k, v, block_bias)


# ------------------------------------------------------------------
# T5 relative position bias (glue, plain JAX)
# ------------------------------------------------------------------

def _relative_position_bucket(relative_position, bidirectional=True,
                              num_buckets=32, max_distance=128):
    relative_buckets = jnp.zeros_like(relative_position)
    if bidirectional:
        num_buckets //= 2
        relative_buckets += (relative_position > 0).astype(jnp.int32) * num_buckets
        relative_position = jnp.abs(relative_position)
    else:
        relative_position = -jnp.minimum(relative_position,
                                         jnp.zeros_like(relative_position))
    max_exact = num_buckets // 2
    is_small = relative_position < max_exact
    safe_rp = jnp.maximum(relative_position, 1).astype(jnp.float32)
    rp_if_large = max_exact + (
        jnp.log(safe_rp / max_exact) / math.log(max_distance / max_exact)
        * (num_buckets - max_exact)
    ).astype(jnp.int32)
    rp_if_large = jnp.minimum(rp_if_large, num_buckets - 1)
    relative_buckets += jnp.where(is_small, relative_position, rp_if_large)
    return relative_buckets


def compute_virtual_bias(query_length, key_length, rel_bias_weight,
                         is_decoder, num_buckets, max_distance):
    """'Virtual' bias of shape (1, H, Q+K-1), as in the PyTorch compute_bias."""
    virtual_position = jnp.arange(-query_length + 1, key_length, dtype=jnp.int32)
    buckets = _relative_position_bucket(
        virtual_position, bidirectional=not is_decoder,
        num_buckets=num_buckets, max_distance=max_distance)
    virt_values = rel_bias_weight[buckets]              # (Q+K-1, H)
    return jnp.transpose(virt_values)[None, :, :]        # (1, H, Q+K-1)


def build_block_bias(virt_bias, query_length, key_length, block, dtype):
    """(1, H, Q+K-1) -> deduplicated diagonal-block table (nq+nk-1, H, t, t) with
    table[ki-qi+nq-1, h, r, c] == full_bias[h, qi*t + r, ki*t + c].
    The full (H, Q, K) bias is never materialized."""
    nq = query_length // block
    nk = key_length // block
    n_diag = nq + nk - 1
    d_off = (jnp.arange(n_diag) - (nq - 1)) * block                 # (n_diag,)
    r_idx = jnp.arange(block)
    c_idx = jnp.arange(block)
    idx = (d_off[:, None, None]
           + c_idx[None, None, :] - r_idx[None, :, None]
           + query_length - 1)                                       # (n_diag, t, t)
    tbl = virt_bias[0][:, idx]                                       # (H, n_diag, t, t)
    return jnp.transpose(tbl, (1, 0, 2, 3)).astype(dtype)            # (n_diag, H, t, t)


def expand_virtual_bias(virt_bias, query_length, key_length):
    """(1, H, Q+K-1) -> (H, Q, K). Only used by the pure-JAX reference."""
    q_idx = jnp.arange(query_length)[:, None]
    k_idx = jnp.arange(key_length)[None, :]
    idx = k_idx - q_idx + query_length - 1
    return virt_bias[0][:, idx]


# ------------------------------------------------------------------
# Forward pass (self-attention path)
# ------------------------------------------------------------------

def prepare_params(params, compute_dtype=jnp.bfloat16):
    """One-time parameter prep (call OUTSIDE jit): fuse QKV weights + cast to bf16."""
    wqkv = jnp.concatenate([params["wq"], params["wk"], params["wv"]], axis=0)
    return {
        "wqkv": wqkv.astype(compute_dtype),                  # (3*inner, d_model)
        "wo": params["wo"].astype(compute_dtype),            # (d_model, inner)
        "rel_bias": params["rel_bias"].astype(jnp.float32),  # (num_buckets, H)
    }


def flash_t5_attention_v2_forward(hidden_states, prepared, *, n_heads, d_kv,
                                  num_buckets, max_distance,
                                  is_causal=False, is_decoder=False,
                                  has_relative_attention_bias=True):
    # TODO(synk): attention/padding `mask`, decoder KV-cache, cross-attention
    # (key_value_states / past_key_value / use_cache) paths are not implemented.
    B, S, d_model = hidden_states.shape
    inner_dim = n_heads * d_kv
    out_dtype = hidden_states.dtype
    cdtype = prepared["wqkv"].dtype

    x2d = hidden_states.astype(cdtype).reshape(B * S, d_model)

    # Fused QKV projection: one activation read, one tiled bf16 matmul (f32 acc).
    qkv = linear_nobias(x2d, prepared["wqkv"], out_dtype=cdtype)   # (B*S, 3*inner)
    qkv = qkv.reshape(B, S, 3, n_heads, d_kv)
    # TODO(synk): lane-dense head-packed (B, S, H*D) attention layout would remove
    # these activation transposes entirely.
    q = qkv[:, :, 0].transpose(0, 2, 1, 3)                         # (B, H, S, D)
    k = qkv[:, :, 1].transpose(0, 2, 1, 3)
    v = qkv[:, :, 2].transpose(0, 2, 1, 3)

    # Query/KV tile: 256 when divisible (fills the 256-wide v6e/v7x MXU), else 128,
    # else the full (small) sequence.
    block = _pick_tile(S, (256, 128))
    nq = S // block
    n_diag = 2 * nq - 1

    # Heads packed per grid step (batched matmuls -> less grid overhead).
    hp = max(1, min(n_heads, 128 // max(1, d_kv)))
    while n_heads % hp != 0:
        hp -= 1

    if has_relative_attention_bias:
        position_bias = compute_virtual_bias(
            S, S, prepared["rel_bias"], is_decoder, num_buckets, max_distance)
        block_bias = build_block_bias(position_bias, S, S, block, cdtype)
    else:
        position_bias = jnp.zeros((1, n_heads, S, S), out_dtype)
        block_bias = jnp.zeros((n_diag, n_heads, block, block), cdtype)

    sm_scale = 1.0  # T5 does not scale attention logits
    attn = flash_attention(q, k, v, block_bias, block=block, heads_per_step=hp,
                           causal=is_causal, sm_scale=sm_scale)    # (B, H, S, D)

    attn2d = attn.transpose(0, 2, 1, 3).reshape(B * S, inner_dim)
    attn_output = linear_nobias(attn2d, prepared["wo"],
                                out_dtype=out_dtype).reshape(B, S, d_model)

    present_key_value_state = None  # TODO(synk): decoder cache path
    return attn_output, present_key_value_state, position_bias


# ------------------------------------------------------------------
# Pure-JAX reference (for correctness check, f32)
# ------------------------------------------------------------------

def reference_forward(hidden_states, params, *, n_heads, d_kv,
                      num_buckets, max_distance, is_causal, is_decoder):
    B, S, d_model = hidden_states.shape

    def proj(w):
        y = jnp.einsum("bsd,nd->bsn", hidden_states, w)
        return y.reshape(B, S, n_heads, d_kv).transpose(0, 2, 1, 3)

    q, k, v = proj(params["wq"]), proj(params["wk"]), proj(params["wv"])
    virt = compute_virtual_bias(S, S, params["rel_bias"], is_decoder,
                                num_buckets, max_distance)
    bias_full = expand_virtual_bias(virt, S, S)
    logits = jnp.einsum("bhqd,bhkd->bhqk", q, k) + bias_full[None]
    if is_causal:
        mask = jnp.tril(jnp.ones((S, S), bool))
        logits = jnp.where(mask[None, None], logits, -jnp.inf)
    p = jax.nn.softmax(logits, axis=-1)
    o = jnp.einsum("bhqk,bhkd->bhqd", p, v)
    o = o.transpose(0, 2, 1, 3).reshape(B, S, n_heads * d_kv)
    return jnp.einsum("bsi,di->bsd", o, params["wo"])


# ------------------------------------------------------------------

def _make_params(key, d_model, n_heads, d_kv, num_buckets):
    inner = n_heads * d_kv
    k2, k3, k4, k5, k6 = jax.random.split(key, 5)
    w_scale = 0.3 / math.sqrt(d_model)
    return {
        "wq": jax.random.normal(k2, (inner, d_model), jnp.float32) * w_scale,
        "wk": jax.random.normal(k3, (inner, d_model), jnp.float32) * w_scale,
        "wv": jax.random.normal(k4, (inner, d_model), jnp.float32) * w_scale,
        "wo": jax.random.normal(k5, (d_model, inner), jnp.float32) * w_scale,
        "rel_bias": jax.random.normal(k6, (num_buckets, n_heads), jnp.float32) * 0.1,
    }


if __name__ == "__main__":
    num_buckets, max_distance = 32, 128
    configs = [
        # (B, S, d_model, n_heads, d_kv)
        (2, 8, 32, 4, 8),        # tiny smoke config (single block, hp == H)
        (1, 384, 128, 4, 64),    # 128-tiles, multi-block KV loop, causal loop bound,
                                 # diag-bias dynamic indexing, head groups (hp=2 < H)
    ]
    root = jax.random.PRNGKey(0)
    for ci, (B, S, d_model, n_heads, d_kv) in enumerate(configs):
        kx, kp = jax.random.split(jax.random.fold_in(root, ci))
        hidden_states = jax.random.normal(kx, (B, S, d_model), jnp.float32)
        params = _make_params(kp, d_model, n_heads, d_kv, num_buckets)
        prepared = prepare_params(params)   # QKV fuse + bf16 cast, outside jit
        for is_causal in (False, True):
            fwd = jax.jit(functools.partial(
                flash_t5_attention_v2_forward,
                n_heads=n_heads, d_kv=d_kv,
                num_buckets=num_buckets, max_distance=max_distance,
                is_causal=is_causal, is_decoder=False,
                has_relative_attention_bias=True))
            attn_out, present_kv, position_bias = fwd(hidden_states, prepared)
            attn_out = jax.block_until_ready(attn_out)

            ref = reference_forward(
                hidden_states, params, n_heads=n_heads, d_kv=d_kv,
                num_buckets=num_buckets, max_distance=max_distance,
                is_causal=is_causal, is_decoder=False)
            np.testing.assert_allclose(np.asarray(attn_out, dtype=np.float32),
                                       np.asarray(ref), rtol=2e-2, atol=2e-2)
            assert present_kv is None
            assert position_bias.shape == (1, n_heads, 2 * S - 1)

    print("KERNEL_OK")
</pallas_src>

<mosaic_0001>
module attributes {stable_mosaic.version = 11 : i64} {
  func.func @_matmul_kernel(%arg0: i32, %arg1: i32, %arg2: i32, %arg3: memref<16x32xbf16, #tpu.memory_space<vmem>>, %arg4: memref<96x32xbf16, #tpu.memory_space<vmem>>, %arg5: memref<16x96xbf16, #tpu.memory_space<vmem>>, %arg6: memref<16x96xf32, #tpu.memory_space<vmem>>) attributes {dimension_semantics = [#tpu.dimension_semantics<parallel>, #tpu.dimension_semantics<parallel>, #tpu.dimension_semantics<arbitrary>], iteration_bounds = array<i64: 1, 1, 1>, scalar_prefetch = 0 : i64, scratch_operands = 1 : i64, tpu.core_type = #tpu.core_type<tc>, window_params = [{transform_indices = @transform_0, window_bounds = array<i64: 16, 32>}, {transform_indices = @transform_1, window_bounds = array<i64: 96, 32>}, {transform_indices = @transform_2, window_bounds = array<i64: 16, 96>}]} {
    %c0_i32 = arith.constant 0 : i32
    %0 = arith.cmpi eq, %arg2, %c0_i32 : i32
    %1 = arith.extui %0 : i1 to i32
    %c0_i32_0 = arith.constant 0 : i32
    %2 = arith.cmpi ne, %1, %c0_i32_0 : i32
    scf.if %2 {
      %cst_10 = arith.constant 0.000000e+00 : f32
      %12 = vector.broadcast %cst_10 : f32 to vector<16x96xf32>
      %c0_11 = arith.constant 0 : index
      %c0_12 = arith.constant 0 : index
      %13 = vector.load %arg6[%c0_11, %c0_12] : memref<16x96xf32, #tpu.memory_space<vmem>>, vector<16x96xf32>
      tpu.vector_store %arg6[%c0_11, %c0_12], %12 {strides = array<i32>} : memref<16x96xf32, #tpu.memory_space<vmem>>, vector<16x96xf32>,
    } else {
    }
    %c0 = arith.constant 0 : index
    %c0_1 = arith.constant 0 : index
    %3 = vector.load %arg6[%c0, %c0_1] : memref<16x96xf32, #tpu.memory_space<vmem>>, vector<16x96xf32>
    %c0_2 = arith.constant 0 : index
    %c0_3 = arith.constant 0 : index
    %4 = vector.load %arg3[%c0_2, %c0_3] : memref<16x32xbf16, #tpu.memory_space<vmem>>, vector<16x32xbf16>
    %c0_4 = arith.constant 0 : index
    %c0_5 = arith.constant 0 : index
    %5 = vector.load %arg4[%c0_4, %c0_5] : memref<96x32xbf16, #tpu.memory_space<vmem>>, vector<96x32xbf16>
    %cst = arith.constant dense<0.000000e+00> : vector<16x96xf32>
    %6 = tpu.matmul %4, %5, %cst {dimension_numbers = #tpu.dot_dimension_numbers<[1], [1], [0], [0], [0, 0, 1, 0], [], []>} : vector<16x32xbf16>, vector<96x32xbf16>, vector<16x96xf32> -> vector<16x96xf32>
    %7 = arith.addf %3, %6 : vector<16x96xf32>
    %c0_6 = arith.constant 0 : index
    %c0_7 = arith.constant 0 : index
    %8 = vector.load %arg6[%c0_6, %c0_7] : memref<16x96xf32, #tpu.memory_space<vmem>>, vector<16x96xf32>
    tpu.vector_store %arg6[%c0_6, %c0_7], %7 {strides = array<i32>} : memref<16x96xf32, #tpu.memory_space<vmem>>, vector<16x96xf32>,
    %c0_i32_8 = arith.constant 0 : i32
    %9 = arith.cmpi eq, %arg2, %c0_i32_8 : i32
    %10 = arith.extui %9 : i1 to i32
    %c0_i32_9 = arith.constant 0 : i32
    %11 = arith.cmpi ne, %10, %c0_i32_9 : i32
    scf.if %11 {
      %c0_10 = arith.constant 0 : index
      %c0_11 = arith.constant 0 : index
      %12 = vector.load %arg6[%c0_10, %c0_11] : memref<16x96xf32, #tpu.memory_space<vmem>>, vector<16x96xf32>
      %13 = arith.truncf %12 : vector<16x96xf32> to vector<16x96xbf16>
      %c0_12 = arith.constant 0 : index
      %c0_13 = arith.constant 0 : index
      %14 = vector.load %arg5[%c0_12, %c0_13] : memref<16x96xbf16, #tpu.memory_space<vmem>>, vector<16x96xbf16>
      tpu.vector_store %arg5[%c0_12, %c0_13], %13 {strides = array<i32>} : memref<16x96xbf16, #tpu.memory_space<vmem>>, vector<16x96xbf16>,
    } else {
    }
    return
  }
  func.func @transform_0(%arg0: i32, %arg1: i32, %arg2: i32) -> (i32, i32) {
    %c0_i32 = arith.constant 0 : i32
    return %arg0, %arg2 : i32, i32
  }
  func.func @transform_1(%arg0: i32, %arg1: i32, %arg2: i32) -> (i32, i32) {
    %c0_i32 = arith.constant 0 : i32
    return %arg1, %arg2 : i32, i32
  }
  func.func @transform_2(%arg0: i32, %arg1: i32, %arg2: i32) -> (i32, i32) {
    %c0_i32 = arith.constant 0 : i32
    return %arg0, %arg1 : i32, i32
  }
}

module attributes {stable_mosaic.version = 11 : i64} {
  func.func @_flash_attn_kernel(%arg0: i32, %arg1: i32, %arg2: i32, %arg3: memref<1x4x8x8xbf16, #tpu.memory_space<vmem>>, %arg4: memref<1x4x8x8xbf16, #tpu.memory_space<vmem>>, %arg5: memref<1x4x8x8xbf16, #tpu.memory_space<vmem>>, %arg6: memref<1x4x8x8xbf16, #tpu.memory_space<vmem>>, %arg7: memref<1x4x8x8xbf16, #tpu.memory_space<vmem>>) attributes {dimension_semantics = [#tpu.dimension_semantics<parallel>, #tpu.dimension_semantics<parallel>, #tpu.dimension_semantics<parallel>], iteration_bounds = array<i64: 2, 1, 1>, scalar_prefetch = 0 : i64, scratch_operands = 0 : i64, tpu.core_type = #tpu.core_type<tc>, window_params = [{transform_indices = @transform_0, window_bounds = array<i64: 1, 4, 8, 8>}, {transform_indices = @transform_1, window_bounds = array<i64: 1, 4, 8, 8>}, {transform_indices = @transform_2, window_bounds = array<i64: 1, 4, 8, 8>}, {transform_indices = @transform_3, window_bounds = array<i64: 1, 4, 8, 8>}, {transform_indices = @transform_4, window_bounds = array<i64: 1, 4, 8, 8>}]} {
    %c0 = arith.constant 0 : index
    %c0_0 = arith.constant 0 : index
    %c0_1 = arith.constant 0 : index
    %c0_2 = arith.constant 0 : index
    %0 = vector.load %arg3[%c0, %c0_0, %c0_1, %c0_2] : memref<1x4x8x8xbf16, #tpu.memory_space<vmem>>, vector<1x4x8x8xbf16>
    %1 = vector.shape_cast %0 : vector<1x4x8x8xbf16> to vector<4x8x8xbf16>
    %cst = arith.constant -1.000000e+30 : f32
    %2 = vector.broadcast %cst : f32 to vector<4x8x1xf32>
    %cst_3 = arith.constant 0.000000e+00 : f32
    %3 = vector.broadcast %cst_3 : f32 to vector<4x8x1xf32>
    %cst_4 = arith.constant 0.000000e+00 : f32
    %4 = vector.broadcast %cst_4 : f32 to vector<4x8x8xf32>
    %c0_i32 = arith.constant 0 : i32
    %c8_i32 = arith.constant 8 : i32
    %5 = arith.muli %c0_i32, %c8_i32 : i32
    %6 = tpu.assume_multiple %5, 8 : i32
    %c0_5 = arith.constant 0 : index
    %c0_6 = arith.constant 0 : index
    %7 = arith.index_cast %6 : i32 to index
    %c0_7 = arith.constant 0 : index
    %8 = vector.load %arg4[%c0_5, %c0_6, %7, %c0_7] : memref<1x4x8x8xbf16, #tpu.memory_space<vmem>>, vector<1x4x8x8xbf16>
    %9 = vector.shape_cast %8 : vector<1x4x8x8xbf16> to vector<4x8x8xbf16>
    %c0_8 = arith.constant 0 : index
    %c0_9 = arith.constant 0 : index
    %10 = arith.index_cast %6 : i32 to index
    %c0_10 = arith.constant 0 : index
    %11 = vector.load %arg5[%c0_8, %c0_9, %10, %c0_10] : memref<1x4x8x8xbf16, #tpu.memory_space<vmem>>, vector<1x4x8x8xbf16>
    %12 = vector.shape_cast %11 : vector<1x4x8x8xbf16> to vector<4x8x8xbf16>
    %13 = arith.subi %c0_i32, %arg2 : i32
    %c1_i32 = arith.constant 1 : i32
    %14 = arith.addi %13, %c1_i32 : i32
    %c1_i32_11 = arith.constant 1 : i32
    %15 = arith.subi %14, %c1_i32_11 : i32
    %16 = arith.index_cast %15 : i32 to index
    %c0_12 = arith.constant 0 : index
    %c0_13 = arith.constant 0 : index
    %c0_14 = arith.constant 0 : index
    %17 = vector.load %arg6[%16, %c0_12, %c0_13, %c0_14] : memref<1x4x8x8xbf16, #tpu.memory_space<vmem>>, vector<1x4x8x8xbf16>
    %18 = vector.shape_cast %17 : vector<1x4x8x8xbf16> to vector<4x8x8xbf16>
    %19 = arith.extf %18 : vector<4x8x8xbf16> to vector<4x8x8xf32>
    %cst_15 = arith.constant dense<0.000000e+00> : vector<4x8x8xf32>
    %20 = tpu.matmul %1, %9, %cst_15 {dimension_numbers = #tpu.dot_dimension_numbers<[2], [2], [1], [1], [0, 0, 0, 1, 1, 1], [0], [0]>} : vector<4x8x8xbf16>, vector<4x8x8xbf16>, vector<4x8x8xf32> -> vector<4x8x8xf32>
    %21 = arith.addf %20, %19 : vector<4x8x8xf32>
    %cst_16 = arith.constant dense<0xFF800000> : vector<4x8xf32>
    %22 = vector.multi_reduction <maximumf>, %21, %cst_16 [2] : vector<4x8x8xf32> to vector<4x8xf32>
    %23 = vector.shape_cast %22 : vector<4x8xf32> to vector<4x8x1xf32>
    %24 = arith.maximumf %2, %23 : vector<4x8x1xf32>
    %25 = arith.subf %2, %24 : vector<4x8x1xf32>
    %26 = math.exp %25 : vector<4x8x1xf32>
    %27 = vector.broadcast %24 : vector<4x8x1xf32> to vector<4x8x8xf32>
    %28 = arith.subf %21, %27 : vector<4x8x8xf32>
    %29 = math.exp %28 : vector<4x8x8xf32>
    %30 = arith.mulf %26, %3 : vector<4x8x1xf32>
    %cst_17 = arith.constant dense<0.000000e+00> : vector<4x8xf32>
    %31 = vector.multi_reduction <add>, %29, %cst_17 [2] : vector<4x8x8xf32> to vector<4x8xf32>
    %32 = vector.shape_cast %31 : vector<4x8xf32> to vector<4x8x1xf32>
    %33 = arith.addf %30, %32 : vector<4x8x1xf32>
    %34 = arith.truncf %29 : vector<4x8x8xf32> to vector<4x8x8xbf16>
    %cst_18 = arith.constant dense<0.000000e+00> : vector<4x8x8xf32>
    %35 = tpu.matmul %34, %12, %cst_18 {dimension_numbers = #tpu.dot_dimension_numbers<[2], [1], [1], [2], [0, 0, 0, 1, 1, 2], [0], [0]>} : vector<4x8x8xbf16>, vector<4x8x8xbf16>, vector<4x8x8xf32> -> vector<4x8x8xf32>
    %36 = vector.broadcast %26 : vector<4x8x1xf32> to vector<4x8x8xf32>
    %37 = arith.mulf %36, %4 : vector<4x8x8xf32>
    %38 = arith.addf %37, %35 : vector<4x8x8xf32>
    %c1_i32_19 = arith.constant 1 : i32
    %cst_20 = arith.constant 1.000000e-30 : f32
    %39 = vector.broadcast %cst_20 : f32 to vector<4x8x1xf32>
    %40 = arith.maximumf %33, %39 : vector<4x8x1xf32>
    %41 = tpu.reciprocal %40 {approx = true} : vector<4x8x1xf32> -> vector<4x8x1xf32>
    %42 = arith.mulf %40, %41 : vector<4x8x1xf32>
    %cst_21 = arith.constant 2.000000e+00 : f32
    %43 = vector.broadcast %cst_21 : f32 to vector<4x8x1xf32>
    %44 = arith.subf %43, %42 : vector<4x8x1xf32>
    %45 = arith.mulf %41, %44 : vector<4x8x1xf32>
    %46 = vector.broadcast %45 : vector<4x8x1xf32> to vector<4x8x8xf32>
    %47 = arith.mulf %38, %46 : vector<4x8x8xf32>
    %48 = arith.truncf %47 : vector<4x8x8xf32> to vector<4x8x8xbf16>
    %c0_22 = arith.constant 0 : index
    %c0_23 = arith.constant 0 : index
    %c0_24 = arith.constant 0 : index
    %c0_25 = arith.constant 0 : index
    %49 = vector.load %arg7[%c0_22, %c0_23, %c0_24, %c0_25] : memref<1x4x8x8xbf16, #tpu.memory_space<vmem>>, vector<1x4x8x8xbf16>
    %50 = vector.shape_cast %49 : vector<1x4x8x8xbf16> to vector<4x8x8xbf16>
    %51 = vector.shape_cast %48 : vector<4x8x8xbf16> to vector<1x4x8x8xbf16>
    tpu.vector_store %arg7[%c0_22, %c0_23, %c0_24, %c0_25], %51 {strides = array<i32>} : memref<1x4x8x8xbf16, #tpu.memory_space<vmem>>, vector<1x4x8x8xbf16>,
    return
  }
  func.func @transform_0(%arg0: i32, %arg1: i32, %arg2: i32) -> (i32, i32, i32, i32) {
    %c0_i32 = arith.constant 0 : i32
    %c0_i32_0 = arith.constant 0 : i32
    return %arg0, %arg1, %arg2, %c0_i32 : i32, i32, i32, i32
  }
  func.func @transform_1(%arg0: i32, %arg1: i32, %arg2: i32) -> (i32, i32, i32, i32) {
    %c0_i32 = arith.constant 0 : i32
    %c0_i32_0 = arith.constant 0 : i32
    %c0_i32_1 = arith.constant 0 : i32
    return %arg0, %arg1, %c0_i32, %c0_i32_0 : i32, i32, i32, i32
  }
  func.func @transform_2(%arg0: i32, %arg1: i32, %arg2: i32) -> (i32, i32, i32, i32) {
    %c0_i32 = arith.constant 0 : i32
    %c0_i32_0 = arith.constant 0 : i32
    %c0_i32_1 = arith.constant 0 : i32
    return %arg0, %arg1, %c0_i32, %c0_i32_0 : i32, i32, i32, i32
  }
  func.func @transform_3(%arg0: i32, %arg1: i32, %arg2: i32) -> (i32, i32, i32, i32) {
    %c0_i32 = arith.constant 0 : i32
    %c0_i32_0 = arith.constant 0 : i32
    %c0_i32_1 = arith.constant 0 : i32
    %c0_i32_2 = arith.constant 0 : i32
    return %c0_i32, %arg1, %c0_i32_0, %c0_i32_1 : i32, i32, i32, i32
  }
  func.func @transform_4(%arg0: i32, %arg1: i32, %arg2: i32) -> (i32, i32, i32, i32) {
    %c0_i32 = arith.constant 0 : i32
    %c0_i32_0 = arith.constant 0 : i32
    return %arg0, %arg1, %arg2, %c0_i32 : i32, i32, i32, i32
  }
}

module attributes {stable_mosaic.version = 11 : i64} {
  func.func @_matmul_kernel(%arg0: i32, %arg1: i32, %arg2: i32, %arg3: memref<16x32xbf16, #tpu.memory_space<vmem>>, %arg4: memref<32x32xbf16, #tpu.memory_space<vmem>>, %arg5: memref<16x32xf32, #tpu.memory_space<vmem>>, %arg6: memref<16x32xf32, #tpu.memory_space<vmem>>) attributes {dimension_semantics = [#tpu.dimension_semantics<parallel>, #tpu.dimension_semantics<parallel>, #tpu.dimension_semantics<arbitrary>], iteration_bounds = array<i64: 1, 1, 1>, scalar_prefetch = 0 : i64, scratch_operands = 1 : i64, tpu.core_type = #tpu.core_type<tc>, window_params = [{transform_indices = @transform_0, window_bounds = array<i64: 16, 32>}, {transform_indices = @transform_1, window_bounds = array<i64: 32, 32>}, {transform_indices = @transform_2, window_bounds = array<i64: 16, 32>}]} {
    %c0_i32 = arith.constant 0 : i32
    %0 = arith.cmpi eq, %arg2, %c0_i32 : i32
    %1 = arith.extui %0 : i1 to i32
    %c0_i32_0 = arith.constant 0 : i32
    %2 = arith.cmpi ne, %1, %c0_i32_0 : i32
    scf.if %2 {
      %cst_10 = arith.constant 0.000000e+00 : f32
      %12 = vector.broadcast %cst_10 : f32 to vector<16x32xf32>
      %c0_11 = arith.constant 0 : index
      %c0_12 = arith.constant 0 : index
      %13 = vector.load %arg6[%c0_11, %c0_12] : memref<16x32xf32, #tpu.memory_space<vmem>>, vector<16x32xf32>
      tpu.vector_store %arg6[%c0_11, %c0_12], %12 {strides = array<i32>} : memref<16x32xf32, #tpu.memory_space<vmem>>, vector<16x32xf32>,
    } else {
    }
    %c0 = arith.constant 0 : index
    %c0_1 = arith.constant 0 : index
    %3 = vector.load %arg6[%c0, %c0_1] : memref<16x32xf32, #tpu.memory_space<vmem>>, vector<16x32xf32>
    %c0_2 = arith.constant 0 : index
    %c0_3 = arith.constant 0 : index
    %4 = vector.load %arg3[%c0_2, %c0_3] : memref<16x32xbf16, #tpu.memory_space<vmem>>, vector<16x32xbf16>
    %c0_4 = arith.constant 0 : index
    %c0_5 = arith.constant 0 : index
    %5 = vector.load %arg4[%c0_4, %c0_5] : memref<32x32xbf16, #tpu.memory_space<vmem>>, vector<32x32xbf16>
    %cst = arith.constant dense<0.000000e+00> : vector<16x32xf32>
    %6 = tpu.matmul %4, %5, %cst {dimension_numbers = #tpu.dot_dimension_numbers<[1], [1], [0], [0], [0, 0, 1, 0], [], []>} : vector<16x32xbf16>, vector<32x32xbf16>, vector<16x32xf32> -> vector<16x32xf32>
    %7 = arith.addf %3, %6 : vector<16x32xf32>
    %c0_6 = arith.constant 0 : index
    %c0_7 = arith.constant 0 : index
    %8 = vector.load %arg6[%c0_6, %c0_7] : memref<16x32xf32, #tpu.memory_space<vmem>>, vector<16x32xf32>
    tpu.vector_store %arg6[%c0_6, %c0_7], %7 {strides = array<i32>} : memref<16x32xf32, #tpu.memory_space<vmem>>, vector<16x32xf32>,
    %c0_i32_8 = arith.constant 0 : i32
    %9 = arith.cmpi eq, %arg2, %c0_i32_8 : i32
    %10 = arith.extui %9 : i1 to i32
    %c0_i32_9 = arith.constant 0 : i32
    %11 = arith.cmpi ne, %10, %c0_i32_9 : i32
    scf.if %11 {
      %c0_10 = arith.constant 0 : index
      %c0_11 = arith.constant 0 : index
      %12 = vector.load %arg6[%c0_10, %c0_11] : memref<16x32xf32, #tpu.memory_space<vmem>>, vector<16x32xf32>
      %c0_12 = arith.constant 0 : index
      %c0_13 = arith.constant 0 : index
      %13 = vector.load %arg5[%c0_12, %c0_13] : memref<16x32xf32, #tpu.memory_space<vmem>>, vector<16x32xf32>
      tpu.vector_store %arg5[%c0_12, %c0_13], %12 {strides = array<i32>} : memref<16x32xf32, #tpu.memory_space<vmem>>, vector<16x32xf32>,
    } else {
    }
    return
  }
  func.func @transform_0(%arg0: i32, %arg1: i32, %arg2: i32) -> (i32, i32) {
    %c0_i32 = arith.constant 0 : i32
    return %arg0, %arg2 : i32, i32
  }
  func.func @transform_1(%arg0: i32, %arg1: i32, %arg2: i32) -> (i32, i32) {
    %c0_i32 = arith.constant 0 : i32
    return %arg1, %arg2 : i32, i32
  }
  func.func @transform_2(%arg0: i32, %arg1: i32, %arg2: i32) -> (i32, i32) {
    %c0_i32 = arith.constant 0 : i32
    return %arg0, %arg1 : i32, i32
  }
}

</mosaic_0001>

<bundles_post_ra>
// kernel: flash_t5_attention_v2_forward.3
= control target key start
LH: loop header
LB: loop body
LE: loop exit
PB: predicated region body
PF: predicated region fallthrough
CT: control target
= control target key end

     0   :  { %vm70_vm0 = vcmask 261120   ;;  %vm16_vm1 = vcmask 785408   ;;  %v202_v0 = vmov 0.0   ;;  %vm203_vm2 = vmmov 0   ;;  %s257_s1 = inlined_call_operand.vmem [shape: bf16[96,32], index: 1, kind: input, shape index: {}]   ;;  %s258_s0 = inlined_call_operand.vmem [shape: bf16[16,32], index: 0, kind: input, shape index: {}]   ;;  %s259_s2 = inlined_call_operand.vmem [shape: bf16[16,96], index: 2, kind: output, shape index: {}]  }
   0x1   :  { %177 = vmatprep.subr.bf16.mxu0 %v202_v0  ;;  %v195_v1 = vld [vmem:[%s257_s1 + $0x28] sm:$0xff]   ;;  %189 = vmatprep.mubr.msk.bf16.mxu0 %vm203_vm2, %v202_v0  ;;  %17 = vst.msk [vmem:[#allocation2] sm:$0xff] %vm16_vm1, %v202_v0  ;;  %18 = vst.msk [vmem:[#allocation2 + $0x8] sm:$0xff] %vm16_vm1, %v202_v0  ;;  %v196_v3 = vld [vmem:[%s257_s1 + $0x20] sm:$0xff]   ;;  %vm151_vm3 = vcmask 781312  }
   0x2   :  { %v90_v2 = vsel %vm70_vm0, %v195_v1, 0  ;;  %v87_v4 = vsel %vm70_vm0, %v196_v3, 0  ;;  %v197_v5 = vld [vmem:[%s257_s1 + $0x18] sm:$0xff]   ;;  %v198_v7 = vld [vmem:[%s257_s1 + $0x10] sm:$0xff]   ;;  %v199_v9 = vld [vmem:[%s257_s1 + $0x8] sm:$0xff]  }
   0x3   :  { %178 = vmatpush3.bf16.xpose.msra.mxu0 %v90_v2  ;;  %v84_v6 = vsel %vm70_vm0, %v197_v5, 0  ;;  %v81_v8 = vsel %vm70_vm0, %v198_v7, 0  ;;  %v78_v10 = vsel %vm70_vm0, %v199_v9, 0  ;;  %v200_v11 = vld [vmem:[%s257_s1] sm:$0xff]  }
   0x4   :  { %179 = vmatprep.subr.bf16.mxu0 %v202_v0  ;;  %v75_v12 = vsel %vm70_vm0, %v200_v11, 0  ;;  %v201_v13 = vld [vmem:[%s258_s0] sm:$0xff]  }
   0x8   :  { %v19_v14 = vld [vmem:[#allocation2] sm:$0xff]  ;;  %v20_v18 = vld [vmem:[#allocation2 + $0x8] sm:$0xff] }
   0xb   :  { %180 = vmatpush3.bf16.xpose.msra.mxu0 %v87_v4 }
   0xc   :  { %181 = vmatprep.subr.bf16.mxu0 %v202_v0 }
  0x13   :  { %182 = vmatpush3.bf16.xpose.msra.mxu0 %v84_v6 }
  0x14   :  { %183 = vmatprep.subr.bf16.mxu0 %v202_v0 }
  0x1b   :  { %184 = vmatpush3.bf16.xpose.msra.mxu0 %v81_v8 }
  0x1c   :  { %185 = vmatprep.subr.bf16.mxu0 %v202_v0 }
  0x23   :  { %186 = vmatpush3.bf16.xpose.msra.mxu0 %v78_v10 }
  0x24   :  { %187 = vmatprep.subr.bf16.mxu0 %v202_v0 }
  0x2b   :  { %188 = vmatpush3.bf16.xpose.msra.mxu0 %v75_v12 }
  0x32   :  { %190 = vmatmul.mubr.msk.bf16.vlgmr.msra.gmra.mxu0 %vm70_vm0, %v201_v13 }
  0xf2   :  { %v126_v15 = vpop.f32.mrf.mxu0 }
  0xf3   :  { %v133_v16 = vadd.f32 %v126_v15, %v19_v14 }
  0xf4   :  { %v191_v17 = vpop.f32.mrf.mxu0 }
  0xf5   :  { %136 = vst.msk [vmem:[#allocation2] sm:$0xff] %vm16_vm1, %v133_v16 }
  0xf6   :  { %v129_v19 = vpop.f32.mrf.mxu0 }
  0xf7   :  { %v134_v20 = vadd.f32 %v129_v19, %v20_v18 }
  0xf8   :  { %v192_v21 = vpop.f32.mrf.mxu0 }
  0xf9   :  { %137 = vst.msk [vmem:[#allocation2 + $0x8] sm:$0xff] %vm16_vm1, %v134_v20 }
  0xfc   :  { %v141_v22 = vld [vmem:[#allocation2] sm:$0xff] }
  0xfd   :  { %v168_v23 = vpack.c.bf16 %v141_v22, %v141_v22 }
  0xff   :  { %152 = vst.msk [vmem:[%s259_s2] sm:$0xf] %vm151_vm3, %v168_v23 }
 0x100   :  { %v142_v24 = vld [vmem:[#allocation2 + $0x8] sm:$0xff] }
 0x101   :  { %v169_v25 = vpack.c.bf16 %v142_v24, %v142_v24 }
 0x103   :  { %153 = vst.msk [vmem:[%s259_s2 + $0x4] sm:$0xf] %vm151_vm3, %v169_v25 }

// kernel: flash_t5_attention_v2_forward.5
= control target key start
LH: loop header
LB: loop body
LE: loop exit
PB: predicated region body
PF: predicated region fallthrough
CT: control target
= control target key end

     0   :  { %vm17_vm0 = vcmask 261120   ;;  %v166_v0 = vmov 0.0   ;;  %vm167_vm1 = vmmov 0   ;;  %s207_s0 = inlined_call_operand.vmem [shape: bf16[16,32], index: 0, kind: input, shape index: {}]   ;;  %s208_s1 = inlined_call_operand.vmem [shape: bf16[32,32], index: 1, kind: input, shape index: {}]   ;;  %s209_s2 = inlined_call_operand.hbm [shape: f32[16,32], index: 2, kind: output, shape index: {}]  }
   0x1   :  { %128 = vmatprep.subr.bf16.mxu0 %v166_v0  ;;  %v141_v1 = vld [vmem:[%s208_s1 + $0x8] sm:$0xff]   ;;  %18 = vst.msk [vmem:[#allocation2] sm:$0xff] %vm17_vm0, %v166_v0  ;;  %19 = vst.msk [vmem:[#allocation2 + $0x8] sm:$0xff] %vm17_vm0, %v166_v0  ;;  %132 = vmatprep.mubr.msk.bf16.mxu0 %vm167_vm1, %v166_v0 }
   0x2   :  { %v51_v2 = vsel %vm17_vm0, %v141_v1, 0 }
   0x3   :  { %7 = vsyncpa [#allocation4], 0  ;;  %129 = vmatpush3.bf16.xpose.msra.mxu0 %v51_v2  ;;  %v142_v3 = vld [vmem:[%s208_s1] sm:$0xff]   ;;  %s168_s1 = smov [#allocation3]  }
   0x4   :  { %130 = vmatprep.subr.bf16.mxu0 %v166_v0  ;;  %v48_v4 = vsel %vm17_vm0, %v142_v3, 0  ;;  %v143_v5 = vld [vmem:[%s207_s0] sm:$0xff]   ;;  %s110_s15 = sshll.u32 %s168_s1, 4  ;;  %s111_s15 = int_to_ptr.vmem [resolvable:$true] %s110_s15 }
   0x5   :  { %s144_s0 = scalar_lea.vmem %s111_s15, 256  ;;  %p149_p1 = scmp.lt.s32.totalorder %s111_s15, %s111_s15 }
   0x6   :  { %p145_p0 = scmp.ne.s32.totalorder %s111_s15, %s144_s0  ;;  %p150_p2 = scmp.lt.s32.totalorder %s144_s0, %s144_s0 }
   0x8   :  { %v20_v6 = vld [vmem:[#allocation2] sm:$0xff]  ;;  %v21_v10 = vld [vmem:[#allocation2 + $0x8] sm:$0xff]  ;;  %p151_p3 = por %p150_p2, %p149_p1 }
   0xa   :  { %p152_p4 = pnand %p151_p3, %p145_p0 }
   0xb   :  { %131 = vmatpush3.bf16.xpose.msra.mxu0 %v48_v4 }
  0x12   :  { %133 = vmatmul.mubr.msk.bf16.vlgmr.msra.gmra.mxu0 %vm17_vm0, %v143_v5 }
  0xd2   :  { %v87_v7 = vpop.f32.mrf.mxu0 }
  0xd3   :  { %v94_v8 = vadd.f32 %v87_v7, %v20_v6 }
  0xd4   :  { %v134_v9 = vpop.f32.mrf.mxu0 }
  0xd5   :  { %96 = vst.msk [vmem:[#allocation2] sm:$0xff] %vm17_vm0, %v94_v8 }
  0xd6   :  { %v90_v11 = vpop.f32.mrf.mxu0 }
  0xd7   :  { %v95_v12 = vadd.f32 %v90_v11, %v21_v10 }
  0xd8   :  { %v135_v13 = vpop.f32.mrf.mxu0 }
  0xd9   :  { %97 = vst.msk [vmem:[#allocation2 + $0x8] sm:$0xff] %vm17_vm0, %v95_v12 }
  0xdc   :  { %v101_v14 = vld [vmem:[#allocation2] sm:$0xff] }
  0xdd   :  { %103 = vst.msk [vmem:[#allocation3] sm:$0xff] %vm17_vm0, %v101_v14 }
  0xe0   :  { %v102_v15 = vld [vmem:[#allocation2 + $0x8] sm:$0xff] }
  0xe1   :  { %104 = vst.msk [vmem:[#allocation3 + $0x8] sm:$0xff] %vm17_vm0, %v102_v15 }
  0xe2   :  { %155 = shalt.err (!%p152_p4)
}
  0xe3   :  { %s169_s16 = smov 128   ;;  %s170_s17 = smov 8  }
  0xe4   :  { %116 = dma.vmem_to_hbm [thread:$0]  %s111_s15, 256, %s209_s2, [#allocation4], %s169_s16, %s169_s16, %s170_s17  }
  0xe5   :  { %164 = dma.done.wait [#allocation4], 256  }
  0xe6   :  { %165 = vsyncadd [#allocation4], 4294967040 }
  0xe7   :  { %120 = vsyncpa [#allocation4], 1 }

// kernel: flash_t5_attention_v2_forward.4
= control target key start
LH: loop header
LB: loop body
LE: loop exit
PB: predicated region body
PF: predicated region fallthrough
CT: control target
= control target key end

     0   :  { %s1211_s15 = smov 0   ;;  %s1213_s16 = smov 0   ;;  %s1316_s0 = inlined_call_operand.vmem [shape: bf16[2,4,8,8], index: 0, kind: input, shape index: {}]   ;;  %s1317_s1 = inlined_call_operand.vmem [shape: bf16[2,4,8,8], index: 1, kind: input, shape index: {}]   ;;  %s1318_s2 = inlined_call_operand.vmem [shape: bf16[2,4,8,8], index: 2, kind: input, shape index: {}]   ;;  %s1319_s3 = inlined_call_operand.vmem [shape: bf16[1,4,8,8], index: 3, kind: input, shape index: {}]   ;;  %s1320_s4 = inlined_call_operand.vmem [shape: bf16[2,4,8,8], index: 4, kind: output, shape index: {}]  }
   0x1   :  { %s1215_s17 = smov 0  }
   0x2 LB: > { %s33_s18 = sadd.s32 1, %s1178_s16  ;;  %p1014_p0 = scmp.ge.s32.totalorder %s1182_s17, 1  ;;  %s1182_s17 = sphi %s1215_s17, %s14_s17   ;;  %s1178_s16 = sphi %s1213_s16, %s1322_s16   ;;  %s1174_s15 = sphi %s1211_s15, %s1321_s15  }
   0x3   : > { %p35_p1 = scmp.ge.s32.totalorder %s33_s18, 2  ;;  %p242_p2 = scmp.lt.s32.totalorder %s1182_s17, 3 }
   0x5   : > { %s1324_s18 = smov (%p35_p1, %s33_s18), 0  ;;  %p243_p3 = pnand %p1014_p0, %p242_p2 }
   0x6   : > { %p306_p4 = scmp.lt.s32.totalorder (!%p243_p3), %s1174_s15, 1 }
   0x7   : > { %246 = sbr.rel (%p243_p3) target bundleno = 592 (0x250), region = 36 }
   0xc   : > { %v1184_v0 = vmov 0.0   ;;  %s1326_s15 = smov (!%p306_p4, %s1174_s15), 1  ;;  %vm1185_vm0 = vmmov 0   ;;  %vm382_vm1 = vcmask 64512   ;;  %v1038_v13 = vld [vmem:[%s1319_s3] sm:$0xff]   ;;  %v1045_v22 = vld [vmem:[%s1319_s3 + $0x8] sm:$0xff]  }
   0xd   : > { %1062 = vmatprep.subr.bf16.mxu0 %v1184_v0  ;;  %1068 = vmatprep.subr.bf16.mxu1 %v1184_v0  ;;  %s1235_s19 = sshll.u32 %s1326_s15, 4  ;;  %v1039_v14 = vunpack.c.l.bf16 %v1038_v13  ;;  %v1040_v15 = vunpack.c.h.bf16 %v1038_v13  ;;  %v1044_v26 = vunpack.c.h.bf16 %v1045_v22  ;;  %v1043_v28 = vunpack.c.l.bf16 %v1045_v22 }
   0xe   : > { %1064 = vmatprep.mubr.msk.bf16.mxu0 %vm1185_vm0, %v1184_v0  ;;  %1070 = vmatprep.mubr.msk.bf16.mxu1 %vm1185_vm0, %v1184_v0  ;;  %s326_s22 = scalar_lea.vmem %s1317_s1, %s1235_s19  ;;  %s316_s25 = scalar_lea.vmem %s1316_s0, %s1235_s19  ;;  %vm634_vm2 = vcmask 1043456   ;;  %vm848_vm3 = vcmask 60416  }
   0xf   : > { %v362_v1 = vld [vmem:[%s326_s22] sm:$0xf]  ;;  %v363_v2 = vld [vmem:[%s326_s22 + $0x4] sm:$0xf]  ;;  %v364_v5 = vld [vmem:[%s326_s22 + $0x8] sm:$0xf]  ;;  %s336_s6 = scalar_lea.vmem %s1318_s2, %s1235_s19  ;;  %s1297_s9 = scalar_lea.vmem %s1320_s4, %s1235_s19 }
  0x10   : > { %v387_v3 = vsel %vm382_vm1, %v362_v1, 0  ;;  %v433_v4 = vsel %vm382_vm1, %v363_v2, 0  ;;  %v365_v6 = vld [vmem:[%s326_s22 + $0xc] sm:$0xf]  ;;  %v358_v7 = vld [vmem:[%s316_s25] sm:$0xf] }
  0x11   : > { %1063 = vmatpush3.bf16.xpose.msra.mxu0 %v387_v3  ;;  %1069 = vmatpush3.bf16.xpose.msra.mxu1 %v433_v4  ;;  %v359_v8 = vld [vmem:[%s316_s25 + $0x4] sm:$0xf]  ;;  %v479_v9 = vsel %vm382_vm1, %v364_v5, 0  ;;  %v525_v10 = vsel %vm382_vm1, %v365_v6, 0  ;;  %v360_v11 = vld [vmem:[%s316_s25 + $0x8] sm:$0xf] }
  0x12   : > { %1074 = vmatprep.subr.bf16.mxu0 %v1184_v0  ;;  %1080 = vmatprep.subr.bf16.mxu1 %v1184_v0  ;;  %v361_v12 = vld [vmem:[%s316_s25 + $0xc] sm:$0xf]  ;;  %v366_v43 = vld [vmem:[%s336_s6] sm:$0xf]  ;;  %v367_v45 = vld [vmem:[%s336_s6 + $0x4] sm:$0xf] }
  0x13   : > { %v636_v44 = vsel %vm634_vm2, %v366_v43, 0  ;;  %v682_v46 = vsel %vm634_vm2, %v367_v45, 0  ;;  %v368_v47 = vld [vmem:[%s336_s6 + $0x8] sm:$0xf]  ;;  %v369_v49 = vld [vmem:[%s336_s6 + $0xc] sm:$0xf] }
  0x14   : > { %v728_v48 = vsel %vm634_vm2, %v368_v47, 0  ;;  %v774_v50 = vsel %vm634_vm2, %v369_v49, 0 }
  0x18   : > { %1065 = vmatmul.mubr.msk.bf16.vlgmr.msra.gmra.mxu0 %vm382_vm1, %v358_v7  ;;  %1071 = vmatmul.mubr.msk.bf16.vlgmr.msra.gmra.mxu1 %vm382_vm1, %v359_v8 }
  0x19   : > { %1075 = vmatpush3.bf16.xpose.msra.mxu0 %v479_v9  ;;  %1081 = vmatpush3.bf16.xpose.msra.mxu1 %v525_v10 }
  0x1a   : > { %1076 = vmatprep.mubr.msk.bf16.mxu0 %vm1185_vm0, %v1184_v0  ;;  %1082 = vmatprep.mubr.msk.bf16.mxu1 %vm1185_vm0, %v1184_v0 }
  0x1b   : > { %1086 = vmatprep.subr.bf16.mxu0 %v1184_v0  ;;  %1092 = vmatprep.subr.bf16.mxu1 %v1184_v0 }
  0x20   : > { %1077 = vmatmul.mubr.msk.bf16.vlgmr.msra.gmra.mxu0 %vm382_vm1, %v360_v11  ;;  %1083 = vmatmul.mubr.msk.bf16.vlgmr.msra.gmra.mxu1 %vm382_vm1, %v361_v12 }
  0x21   : > { %1088 = vmatprep.mubr.msk.bf16.mxu0 %vm1185_vm0, %v1184_v0  ;;  %1094 = vmatprep.mubr.msk.bf16.mxu1 %vm1185_vm0, %v1184_v0 }
  0x22   : > { %1087 = vmatpush3.bf16.msra.mxu0 %v636_v44  ;;  %1093 = vmatpush3.bf16.msra.mxu1 %v682_v46 }
  0x23   : > { %1098 = vmatprep.subr.bf16.mxu0 %v1184_v0  ;;  %1104 = vmatprep.subr.bf16.mxu1 %v1184_v0 }
  0xd8   : > { %v423_v16 = vpop.f32.mrf.mxu0  ;;  %v469_v17 = vpop.f32.mrf.mxu1 }
  0xd9   : > { %v424_v18 = vadd.f32 %v1039_v14, %v423_v16  ;;  %v470_v19 = vadd.f32 %v1040_v15, %v469_v17 }
  0xda   : > { %v1066_v20 = vpop.f32.mrf.mxu0  ;;  %v1072_v21 = vpop.f32.mrf.mxu1 }
  0xdb   : > { %v567_v23 = vsel %vm382_vm1, %v424_v18, -inf  ;;  %v570_v27 = vsel %vm382_vm1, %v470_v19, -inf }
  0xdc   : > { %v472_v24 = vpop.f32.mrf.mxu1  ;;  %568 = vmax.xlane.f32.xlu0 %v567_v23  ;;  %v426_v25 = vpop.f32.mrf.mxu0 }
  0xde   : > { %v1067_v29 = vpop.f32.mrf.mxu0  ;;  %v1073_v30 = vpop.f32.mrf.mxu1 }
  0xe0   : > { %v561_v31 = vpop.f32.mrf.mxu1  ;;  %571 = vmax.xlane.f32.xlu0 %v570_v27  ;;  %v515_v32 = vpop.f32.mrf.mxu0 }
  0xe1   : > { %v562_v33 = vadd.f32 %v1044_v26, %v561_v31  ;;  %v516_v34 = vadd.f32 %v1043_v28, %v515_v32 }
  0xe2   : > { %v1078_v35 = vpop.f32.mrf.mxu0  ;;  %v1084_v36 = vpop.f32.mrf.mxu1 }
  0xe3   : > { %v573_v37 = vsel %vm382_vm1, %v516_v34, -inf  ;;  %v576_v40 = vsel %vm382_vm1, %v562_v33, -inf }
  0xe4   : > { %v564_v38 = vpop.f32.mrf.mxu1  ;;  %574 = vmax.xlane.f32.xlu1 %v573_v37  ;;  %v518_v39 = vpop.f32.mrf.mxu0 }
  0xe6   : > { %v1079_v41 = vpop.f32.mrf.mxu0  ;;  %v1085_v42 = vpop.f32.mrf.mxu1 }
  0xe8   : > { %577 = vmax.xlane.f32.xlu1 %v576_v40 }
 0x165   : > { %v569_v51 = vpop.xlane.xlu0 %568 }
 0x166   : > { %v579_v52 = vmax.f32 %v569_v51, -1e+30 }
 0x168   : > { %v595_v53 = vsub.f32 %v424_v18, %v579_v52  ;;  %v583_v16 = vsub.f32 -1e+30, %v579_v52 }
 0x169   : > { %v572_v54 = vpop.xlane.xlu0 %571 }
 0x16a   : > { %v599_v55 = vmul.f32 1.442695, %v595_v53  ;;  %v580_v56 = vmax.f32 %v572_v54, -1e+30  ;;  %v587_v18 = vmul.f32 1.442695, %v583_v16 }
 0x16c   : > { %v596_v57 = vsub.f32 %v470_v19, %v580_v56  ;;  %1136 = vpow2.f32 %v599_v55  ;;  %v584_v17 = vsub.f32 -1e+30, %v580_v56 }
 0x16d   : > { %v575_v58 = vpop.xlane.xlu1 %574 }
 0x16e   : > { %v601_v59 = vmul.f32 1.442695, %v596_v57  ;;  %v581_v60 = vmax.f32 %v575_v58, -1e+30  ;;  %v589_v19 = vmul.f32 1.442695, %v584_v17 }
 0x170   : > { %v597_v61 = vsub.f32 %v516_v34, %v581_v60  ;;  %1138 = vpow2.f32 %v601_v59  ;;  %v585_v20 = vsub.f32 -1e+30, %v581_v60 }
 0x171   : > { %v578_v62 = vpop.xlane.xlu1 %577 }
 0x172   : > { %v603_v63 = vmul.f32 1.442695, %v597_v61  ;;  %v582_v1 = vmax.f32 %v578_v62, -1e+30 }
 0x174   : > { %v598_v2 = vsub.f32 %v562_v33, %v582_v1  ;;  %1140 = vpow2.f32 %v603_v63  ;;  %v586_v21 = vsub.f32 -1e+30, %v582_v1 }
 0x176   : > { %v605_v3 = vmul.f32 1.442695, %v598_v2  ;;  %v593_v22 = vmul.f32 1.442695, %v586_v21 }
 0x178   : > { %1142 = vpow2.f32 %v605_v3 }
 0x179   : > { %v1137_v4 = vpop.eup %1136  ;;  %1144 = vpow2.f32 %v587_v18 }
 0x17a   : > { %v611_v5 = vsel %vm382_vm1, %v1137_v4, 0.0  ;;  %v627_v6 = vpack.c.bf16 %v1137_v4, %v1137_v4  ;;  %1146 = vpow2.f32 %v589_v19 }
 0x17b   : > { %612 = vadd.xlane.f32.xlu0 %v611_v5 }
 0x17c   : > { %1089 = vmatmul.mubr.msk.bf16.vlgmr.msra.gmra.mxu0 %vm382_vm1, %v627_v6 }
 0x17d   : > { %v1139_v7 = vpop.eup %1138  ;;  %1099 = vmatpush3.bf16.msra.mxu0 %v728_v48  ;;  %1100 = vmatprep.mubr.msk.bf16.mxu0 %vm1185_vm0, %v1184_v0 }
 0x17e   : > { %v614_v8 = vsel %vm382_vm1, %v1139_v7, 0.0  ;;  %v628_v9 = vpack.c.bf16 %v1139_v7, %v1139_v7 }
 0x17f   : > { %615 = vadd.xlane.f32.xlu1 %v614_v8 }
 0x180   : > { %1095 = vmatmul.mubr.msk.bf16.vlgmr.msra.gmra.mxu1 %vm382_vm1, %v628_v9 }
 0x181   : > { %v1141_v10 = vpop.eup %1140  ;;  %1105 = vmatpush3.bf16.msra.mxu1 %v774_v50  ;;  %1106 = vmatprep.mubr.msk.bf16.mxu1 %vm1185_vm0, %v1184_v0  ;;  %v591_v0 = vmul.f32 1.442695, %v585_v20 }
 0x182   : > { %v617_v11 = vsel %vm382_vm1, %v1141_v10, 0.0  ;;  %v629_v12 = vpack.c.bf16 %v1141_v10, %v1141_v10 }
 0x183   : > { %618 = vadd.xlane.f32.xlu0 %v617_v11  ;;  %1148 = vpow2.f32 %v591_v0 }
 0x184   : > { %1101 = vmatmul.mubr.msk.bf16.vlgmr.msra.gmra.mxu0 %vm382_vm1, %v629_v12  ;;  %1150 = vpow2.f32 %v593_v22 }
 0x185   : > { %v1143_v13 = vpop.eup %1142 }
 0x186   : > { %v620_v14 = vsel %vm382_vm1, %v1143_v13, 0.0  ;;  %v630_v15 = vpack.c.bf16 %v1143_v13, %v1143_v13  ;;  %v1145_v23 = vpop.eup %1144 }
 0x187   : > { %621 = vadd.xlane.f32.xlu1 %v620_v14  ;;  %v1147_v25 = vpop.eup %1146  ;;  %v607_v26 = vmul.f32 0.0, %v1145_v23 }
 0x188   : > { %1107 = vmatmul.mubr.msk.bf16.vlgmr.msra.gmra.mxu1 %vm382_vm1, %v630_v15  ;;  %v608_v29 = vmul.f32 0.0, %v1147_v25 }
 0x190   : > { %v1149_v30 = vpop.eup %1148 }
 0x191   : > { %v609_v34 = vmul.f32 0.0, %v1149_v30  ;;  %v1151_v35 = vpop.eup %1150 }
 0x192   : > { %v610_v39 = vmul.f32 0.0, %v1151_v35 }
 0x204   : > { %v613_v24 = vpop.xlane.xlu0 %612 }
 0x205   : > { %v623_v27 = vadd.f32 %v613_v24, %v607_v26 }
 0x207   : > { %v820_v32 = vmax.f32 %v623_v27, 1e-30 }
 0x208   : > { %v616_v28 = vpop.xlane.xlu1 %615 }
 0x209   : > { %v624_v31 = vadd.f32 %v616_v28, %v608_v29  ;;  %1152 = vrcp.f32 %v820_v32 }
 0x20b   : > { %v821_v36 = vmax.f32 %v624_v31, 1e-30 }
 0x20c   : > { %v619_v33 = vpop.xlane.xlu0 %618 }
 0x20d   : > { %v625_v37 = vadd.f32 %v619_v33, %v609_v34  ;;  %1154 = vrcp.f32 %v821_v36 }
 0x20f   : > { %v822_v40 = vmax.f32 %v625_v37, 1e-30 }
 0x210   : > { %v622_v38 = vpop.xlane.xlu1 %621 }
 0x211   : > { %v626_v41 = vadd.f32 %v622_v38, %v610_v39  ;;  %1156 = vrcp.f32 %v822_v40 }
 0x213   : > { %v823_v42 = vmax.f32 %v626_v41, 1e-30 }
 0x215   : > { %1158 = vrcp.f32 %v823_v42 }
 0x216   : > { %v1153_v43 = vpop.eup %1152 }
 0x217   : > { %v828_v45 = vmul.f32 %v1153_v43, %v820_v32 }
 0x219   : > { %v832_v47 = vsub.f32 2.0, %v828_v45 }
 0x21a   : > { %v1155_v44 = vpop.eup %1154 }
 0x21b   : > { %v829_v46 = vmul.f32 %v1155_v44, %v821_v36  ;;  %v836_v53 = vmul.f32 %v1153_v43, %v832_v47 }
 0x21d   : > { %v833_v49 = vsub.f32 2.0, %v829_v46 }
 0x21e   : > { %v1157_v48 = vpop.eup %1156 }
 0x21f   : > { %v830_v51 = vmul.f32 %v1157_v48, %v822_v40  ;;  %v837_v59 = vmul.f32 %v1155_v44, %v833_v49 }
 0x221   : > { %v834_v60 = vsub.f32 2.0, %v830_v51 }
 0x222   : > { %v1159_v54 = vpop.eup %1158 }
 0x223   : > { %v831_v61 = vmul.f32 %v1159_v54, %v823_v42  ;;  %v838_v9 = vmul.f32 %v1157_v48, %v834_v60 }
 0x225   : > { %v835_v6 = vsub.f32 2.0, %v831_v61 }
 0x227   : > { %v839_v17 = vmul.f32 %v1159_v54, %v835_v6 }
 0x23c   : > { %v672_v50 = vpop.f32.mrf.mxu0 }
 0x23d   : > { %v816_v52 = vadd.f32 %v672_v50, %v607_v26 }
 0x23e   : > { %v1090_v55 = vpop.f32.mrf.mxu0 }
 0x23f   : > { %v840_v56 = vmul.f32 %v836_v53, %v816_v52 }
 0x240   : > { %v675_v57 = vpop.f32.mrf.mxu0  ;;  %v718_v58 = vpop.f32.mrf.mxu1 }
 0x241   : > { %v844_v62 = vpack.c.bf16 %v840_v56, %v840_v56  ;;  %v817_v63 = vadd.f32 %v718_v58, %v608_v29 }
 0x242   : > { %v1091_v1 = vpop.f32.mrf.mxu0  ;;  %v1096_v2 = vpop.f32.mrf.mxu1 }
 0x243   : > { %849 = vst.msk [vmem:[%s1297_s9] sm:$0xf] %vm848_vm3, %v844_v62  ;;  %v841_v3 = vmul.f32 %v837_v59, %v817_v63 }
 0x244   : > { %v721_v4 = vpop.f32.mrf.mxu1  ;;  %v764_v5 = vpop.f32.mrf.mxu0 }
 0x245   : > { %v845_v7 = vpack.c.bf16 %v841_v3, %v841_v3  ;;  %v818_v8 = vadd.f32 %v764_v5, %v609_v34 }
 0x246   : > { %v1097_v10 = vpop.f32.mrf.mxu1  ;;  %v1102_v11 = vpop.f32.mrf.mxu0 }
 0x247   : > { %850 = vst.msk [vmem:[%s1297_s9 + $0x4] sm:$0xf] %vm848_vm3, %v845_v7  ;;  %v842_v12 = vmul.f32 %v838_v9, %v818_v8 }
 0x248   : > { %v767_v13 = vpop.f32.mrf.mxu0  ;;  %v810_v14 = vpop.f32.mrf.mxu1 }
 0x249   : > { %v846_v15 = vpack.c.bf16 %v842_v12, %v842_v12  ;;  %v819_v16 = vadd.f32 %v810_v14, %v610_v39 }
 0x24a   : > { %v1103_v18 = vpop.f32.mrf.mxu0  ;;  %v1108_v19 = vpop.f32.mrf.mxu1 }
 0x24b   : > { %851 = vst.msk [vmem:[%s1297_s9 + $0x8] sm:$0xf] %vm848_vm3, %v846_v15  ;;  %v843_v20 = vmul.f32 %v839_v17, %v819_v16 }
 0x24c   : > { %v813_v0 = vpop.f32.mrf.mxu1 }
 0x24d   : > { %v847_v21 = vpack.c.bf16 %v843_v20, %v843_v20 }
 0x24e   : > { %v1109_v22 = vpop.f32.mrf.mxu1 }
 0x24f   : > { %852 = vst.msk [vmem:[%s1297_s9 + $0xc] sm:$0xf] %vm848_vm3, %v847_v21 }
 0x250 PF: > { %s14_s17 = sadd.s32 1, %s1182_s17   ;;  %s1321_s15 = smov %s1178_s16 }
 0x251   : > { %p11_p5 = scmp.ge.s32.totalorder %s14_s17, 4   ;;  %s1322_s16 = smov %s1324_s18 }
 0x253   :  { %13 = sbr.rel (!%p11_p5) target bundleno = 2 (0x2), region = 76 }

</bundles_post_ra>
